<compile_context>
chip_gen: v7x
topology: tpu7x:2x2x1
jax: 0.10.0
libtpu: 0.0.40
codegen_flags: <defaults>
</compile_context>

<pallas_src>
import functools

import jax
import jax.numpy as jnp
from jax import lax
from jax.experimental import pallas as pl
from jax.experimental.pallas import tpu as pltpu


def _round_up(x, m):
    return (x + m - 1) // m * m


# ----------------------------------------------------------------------------
# per-chip VMEM budget + tile selection
# ----------------------------------------------------------------------------
_VMEM_BUDGET = None


def _vmem_budget_bytes():
    """Physical VMEM minus headroom, capped at 100 MiB (v5e/v6e), 52 MiB on v7x."""
    global _VMEM_BUDGET
    if _VMEM_BUDGET is None:
        cap = 64 * 1024 * 1024                      # conservative fallback (v7x)
        try:
            info = pltpu.get_tpu_info()
            cap = int(getattr(info, "vmem_capacity_bytes", cap) or cap)
        except Exception:
            pass
        _VMEM_BUDGET = int(min(cap - 12 * 1024 * 1024, 100 * 1024 * 1024))
    return _VMEM_BUDGET


def _vmem_estimate_bytes(ts, tf, D):
    bf, f32 = 2, 4
    x_blk = 2 * ts * D * bf                          # input tokens, double-buffered
    w_blk = 2 * (2 * D * tf + tf * D) * bf           # gate/up/down blocks, double-buffered
    out_blk = 2 * ts * D * bf                        # output block, double-buffered
    acc = ts * D * f32                               # f32 accumulator scratch
    gates = 2 * 2 * ts * f32                         # routing-weight block
    interm = (3 * ts * tf + ts * D) * f32            # f32 gate/up/h + dot result
    return x_blk + w_blk + out_blk + acc + gates + interm


def _select_tiles(T, D, F_pad, budget):
    """Largest (ts, tf) that fits the budget; ts chosen so ns == 1 for T <= 512."""
    ts0 = min(512, _round_up(max(T, 1), 16))
    ts_cands = [c for c in (512, 256, 128, 64, 32, 16) if c <= ts0]
    if not ts_cands or ts_cands[0] != ts0:
        ts_cands.insert(0, ts0)
    tf_cands = [c for c in (1024, 512, 256, 128) if F_pad % c == 0] or [F_pad]
    for ts in ts_cands:
        for tf in tf_cands:
            if _vmem_estimate_bytes(ts, tf, D) <= budget:
                return ts, tf
    return ts_cands[-1], tf_cands[-1]


# ----------------------------------------------------------------------------
# Pallas kernel: fused routed-experts + shared-experts MoE
# ----------------------------------------------------------------------------
def _moe_kernel(perm_ref, act_ref, x_ref, wg_ref, wu_ref, wd_ref, topk_ref,
                o_ref, acc_ref):
    # grid = (token_tiles, experts, F_tiles)
    e = pl.program_id(1)
    f = pl.program_id(2)

    @pl.when(jnp.logical_and(e == 0, f == 0))
    def _init():
        acc_ref[...] = jnp.zeros_like(acc_ref)

    @pl.when(act_ref[e] > 0)          # skip MXU work for unrouted (dead) experts
    def _expert():
        x = x_ref[...]                                                     # [TS, D] bf16
        gate = jnp.dot(x, wg_ref[0], preferred_element_type=jnp.float32)   # [TS, TF] f32
        up = jnp.dot(x, wu_ref[0], preferred_element_type=jnp.float32)     # [TS, TF] f32
        h = (gate * jax.nn.sigmoid(gate)) * up                             # SiLU-and-mul, f32
        h = h * topk_ref[0]                        # fold routing weight on [TS,TF] (not [TS,D])
        acc_ref[...] += jnp.dot(h.astype(x.dtype), wd_ref[0],
                                preferred_element_type=jnp.float32)        # [TS, D] f32

    @pl.when(jnp.logical_and(e == pl.num_programs(1) - 1,
                             f == pl.num_programs(2) - 1))
    def _finalize():
        o_ref[...] = acc_ref[...].astype(o_ref.dtype)


def fused_moe_with_shared(x, w_gate, w_up, w_down, gates, perm, act, *,
                          ts, tf, expected_active, vmem_limit):
    """x:[Tp,D] bf16, w_*:[E_tot,...] bf16, gates:[E_tot,Tp,1] f32, perm/act:[E_tot] i32."""
    T_pad, D = x.shape
    E_tot, _, F_pad = w_gate.shape
    ns, ne, nf = T_pad // ts, E_tot, F_pad // tf

    # index maps (scalar-prefetch refs perm `p` / active `a` are trailing args).
    # Dead slots pin BOTH the expert index (via p) and the F-tile index (via f_pin)
    # so the weight block index never changes across dead steps -> no weight DMA.
    def _x_map(s, e, f, p, a):
        return (s, 0)

    def _wgu_map(s, e, f, p, a):
        f_pin = f * a[e] + (nf - 1) * (1 - a[e])
        return (p[e], 0, f_pin)

    def _wd_map(s, e, f, p, a):
        f_pin = f * a[e] + (nf - 1) * (1 - a[e])
        return (p[e], f_pin, 0)

    def _g_map(s, e, f, p, a):
        return (p[e], s, 0)

    def _o_map(s, e, f, p, a):
        return (s, 0)

    itemsize = jnp.dtype(x.dtype).itemsize
    cost = pl.CostEstimate(
        flops=int(2 * T_pad * D * F_pad * 3 * expected_active),
        transcendentals=int(T_pad * F_pad * expected_active),
        bytes_accessed=int((w_gate.size + w_up.size + w_down.size) * itemsize
                           + 2 * T_pad * D * itemsize),
    )

    return pl.pallas_call(
        _moe_kernel,
        out_shape=jax.ShapeDtypeStruct((T_pad, D), x.dtype),
        grid_spec=pltpu.PrefetchScalarGridSpec(
            num_scalar_prefetch=2,                  # perm, act -> SMEM
            grid=(ns, ne, nf),
            in_specs=[
                pl.BlockSpec((ts, D), _x_map),
                pl.BlockSpec((1, D, tf), _wgu_map),
                pl.BlockSpec((1, D, tf), _wgu_map),
                pl.BlockSpec((1, tf, D), _wd_map),
                pl.BlockSpec((1, ts, 1), _g_map),
            ],
            out_specs=pl.BlockSpec((ts, D), _o_map),
            scratch_shapes=[pltpu.VMEM((ts, D), jnp.float32)],
        ),
        compiler_params=pltpu.CompilerParams(
            # TODO(synk): on v7x an expert-axis split across the two TensorCores
            # (pl.core_map) would halve weight HBM traffic per core; token-parallel
            # kept here for simplicity.
            dimension_semantics=("parallel", "arbitrary", "arbitrary"),
            vmem_limit_bytes=int(vmem_limit),
        ),
        cost_estimate=cost,
    )(perm, act, x, w_gate, w_up, w_down, gates)


# ----------------------------------------------------------------------------
# Router (MoEGate) -- plain-JAX glue
# ----------------------------------------------------------------------------
def moe_gate(x, gate_weight, *, top_k, norm_topk_prob, routed_scaling_factor):
    """Greedy top-k over softmax(router_logits), matching MoEGate(topk_method='greedy')."""
    # TODO(synk): group_limited_greedy / noaux_tc topk methods and aux-loss not implemented.
    logits = jnp.dot(x.astype(jnp.float32), gate_weight.astype(jnp.float32))   # [T, E]
    scores = jax.nn.softmax(logits, axis=-1)
    # TODO(synk): top-k selection (sorting) has no clean Pallas equivalent; done in JAX.
    topk_w, topk_idx = lax.top_k(scores, top_k)
    renormalize = top_k > 1 and norm_topk_prob
    if renormalize:
        topk_w = topk_w / (jnp.sum(topk_w, axis=-1, keepdims=True) + 1e-20)
    else:
        topk_w = topk_w * routed_scaling_factor
    return topk_w, topk_idx


# ----------------------------------------------------------------------------
# DeepseekV2MoE.forward
# ----------------------------------------------------------------------------
def deepseek_v2_moe_forward(params, hidden_states, *, cfg):
    B, S, D = hidden_states.shape
    T = B * S
    E = cfg["n_routed_experts"]
    n_sh = cfg["n_shared_experts"]
    E_tot = E + n_sh

    x = hidden_states.reshape(T, D)

    topk_w, topk_idx = moe_gate(
        x, params["gate_weight"],
        top_k=cfg["num_experts_per_tok"],
        norm_topk_prob=cfg["norm_topk_prob"],
        routed_scaling_factor=cfg["routed_scaling_factor"])

    # dense [T, E] routing weights (0 for unrouted expert/token pairs)
    gates_dense = jnp.zeros((T, E), jnp.float32)
    gates_dense = gates_dense.at[jnp.arange(T)[:, None], topk_idx].set(
        topk_w.astype(jnp.float32))

    # shared pseudo-experts get weight 1.0 for every (real) token
    gates_all = jnp.concatenate(
        [jnp.transpose(gates_dense)[:, :, None],
         jnp.ones((n_sh, T, 1), jnp.float32)], axis=0)                    # [E_tot, T, 1]

    # --- dead-expert skipping: active experts first; dead slots repeat the last
    #     active expert's index (weight DMA + compute both skipped in-kernel) ---
    counts = jnp.concatenate([
        jnp.sum(gates_dense > 0.0, axis=0).astype(jnp.int32),
        jnp.full((n_sh,), T, dtype=jnp.int32)])                           # shared always active
    active = counts > 0
    order = jnp.argsort(jnp.where(active, 0, 1)).astype(jnp.int32)        # active slots first
    num_active = jnp.sum(active.astype(jnp.int32))
    slot = jnp.arange(E_tot, dtype=jnp.int32)
    last_active = order[jnp.maximum(num_active - 1, 0)]
    perm = jnp.where(slot < num_active, order, last_active).astype(jnp.int32)
    act = (slot < num_active).astype(jnp.int32)

    # --- tiling: pad tokens so ns == 1 for T <= 512; per-chip VMEM budget ---
    F_pad = params["w_gate"].shape[-1]
    budget = _vmem_budget_bytes()
    ts, tf = _select_tiles(T, D, F_pad, budget)
    T_pad = _round_up(T, ts)
    if T_pad != T:
        x_k = jnp.pad(x, ((0, T_pad - T), (0, 0)))
        gates_k = jnp.pad(gates_all, ((0, 0), (0, T_pad - T), (0, 0)))
    else:
        x_k, gates_k = x, gates_all

    out = fused_moe_with_shared(
        x_k, params["w_gate"], params["w_up"], params["w_down"], gates_k, perm, act,
        ts=ts, tf=tf, expected_active=cfg["num_experts_per_tok"] + n_sh,
        vmem_limit=budget)
    out = out[:T]
    # TODO(synk): dist.all_reduce(out_states) skipped (world_size == 1).
    return out.reshape(B, S, D)


# ----------------------------------------------------------------------------
# pure-JAX f32 reference (same math, whole-array einsums)
# ----------------------------------------------------------------------------
def reference_moe(params, hidden_states, *, cfg):
    B, S, D = hidden_states.shape
    T = B * S
    E = cfg["n_routed_experts"]
    n_sh = cfg["n_shared_experts"]
    x = hidden_states.reshape(T, D).astype(jnp.float32)

    topk_w, topk_idx = moe_gate(
        x, params["gate_weight"],
        top_k=cfg["num_experts_per_tok"],
        norm_topk_prob=cfg["norm_topk_prob"],
        routed_scaling_factor=cfg["routed_scaling_factor"])
    gates_dense = jnp.zeros((T, E), jnp.float32).at[
        jnp.arange(T)[:, None], topk_idx].set(topk_w)
    gates_full = jnp.concatenate(
        [jnp.transpose(gates_dense), jnp.ones((n_sh, T), jnp.float32)], axis=0)

    wg = params["w_gate"].astype(jnp.float32)
    wu = params["w_up"].astype(jnp.float32)
    wd = params["w_down"].astype(jnp.float32)
    g_all = jnp.einsum("td,edf->etf", x, wg)
    u_all = jnp.einsum("td,edf->etf", x, wu)
    h_all = (g_all * jax.nn.sigmoid(g_all)) * u_all
    y_all = jnp.einsum("etf,efd->etd", h_all, wd)
    out = jnp.einsum("et,etd->td", gates_full, y_all)
    return out.reshape(B, S, D)


# ----------------------------------------------------------------------------
# deterministic synthetic parameters (weight preprocessing done once here)
# ----------------------------------------------------------------------------
def init_params(key, cfg):
    D = cfg["hidden_size"]
    F = cfg["moe_intermediate_size"]
    E = cfg["n_routed_experts"]
    n_sh = cfg["n_shared_experts"]
    shared_I = F * n_sh
    keys = jax.random.split(key, 7)

    def w(k, shape, scale=0.02):
        return scale * jax.random.normal(k, shape, jnp.float32)

    # routed experts (fused-MoE layout, gate/up stored separately)
    eg = w(keys[0], (E, D, F))
    eu = w(keys[1], (E, D, F))
    ed = w(keys[2], (E, F, D))
    # shared-experts MLP (intermediate = n_shared * F), split into n_shared
    # pseudo-experts of width F (SwiGLU is separable over the intermediate dim)
    sg = w(keys[3], (D, shared_I))
    su = w(keys[4], (D, shared_I))
    sd = w(keys[5], (shared_I, D))
    sg_e = jnp.transpose(sg.reshape(D, n_sh, F), (1, 0, 2))   # [n_sh, D, F]
    su_e = jnp.transpose(su.reshape(D, n_sh, F), (1, 0, 2))   # [n_sh, D, F]
    sd_e = sd.reshape(n_sh, F, D)                             # [n_sh, F, D]

    w_gate = jnp.concatenate([eg, sg_e], axis=0)              # [E+n_sh, D, F]
    w_up = jnp.concatenate([eu, su_e], axis=0)                # [E+n_sh, D, F]
    w_down = jnp.concatenate([ed, sd_e], axis=0)              # [E+n_sh, F, D]

    # zero-pad the intermediate dim once so kernel F-tiles stay 128-lane aligned
    F_pad = _round_up(F, 128)
    if F_pad != F:
        w_gate = jnp.pad(w_gate, ((0, 0), (0, 0), (0, F_pad - F)))
        w_up = jnp.pad(w_up, ((0, 0), (0, 0), (0, F_pad - F)))
        w_down = jnp.pad(w_down, ((0, 0), (0, F_pad - F), (0, 0)))

    wdtype = jnp.bfloat16
    return {
        "gate_weight": w(keys[6], (D, E)),                    # router stays f32
        "w_gate": w_gate.astype(wdtype),
        "w_up": w_up.astype(wdtype),
        "w_down": w_down.astype(wdtype),
    }


# ----------------------------------------------------------------------------
# main
# ----------------------------------------------------------------------------
if __name__ == "__main__":
    cfg = dict(
        hidden_size=256,
        moe_intermediate_size=128,
        n_routed_experts=8,
        num_experts_per_tok=2,
        n_shared_experts=2,
        norm_topk_prob=True,
        routed_scaling_factor=1.0,
        topk_method="greedy",
        scoring_func="softmax",
    )

    key = jax.random.PRNGKey(0)
    pkey, xkey = jax.random.split(key)
    params = init_params(pkey, cfg)

    B, S = 2, 8
    hidden_states = (0.1 * jax.random.normal(
        xkey, (B, S, cfg["hidden_size"]))).astype(jnp.bfloat16)

    fwd = jax.jit(functools.partial(deepseek_v2_moe_forward, cfg=cfg))
    out = fwd(params, hidden_states)
    jax.block_until_ready(out)

    assert out.shape == (B, S, cfg["hidden_size"])
    assert bool(jnp.all(jnp.isfinite(out.astype(jnp.float32))))

    ref = reference_moe(params, hidden_states, cfg=cfg)
    err = float(jnp.max(jnp.abs(out.astype(jnp.float32) - ref)))
    assert err < 5e-3, f"max abs error too large: {err}"
    print("KERNEL_OK")
</pallas_src>

<mosaic_0001>
module attributes {stable_mosaic.version = 11 : i64} {
  func.func @_moe_kernel(%arg0: i32, %arg1: i32, %arg2: i32, %arg3: memref<10xi32, #tpu.memory_space<smem>>, %arg4: memref<10xi32, #tpu.memory_space<smem>>, %arg5: memref<16x256xbf16, #tpu.memory_space<vmem>>, %arg6: memref<1x256x128xbf16, #tpu.memory_space<vmem>>, %arg7: memref<1x256x128xbf16, #tpu.memory_space<vmem>>, %arg8: memref<1x128x256xbf16, #tpu.memory_space<vmem>>, %arg9: memref<1x16x1xf32, #tpu.memory_space<vmem>>, %arg10: memref<16x256xbf16, #tpu.memory_space<vmem>>, %arg11: memref<16x256xf32, #tpu.memory_space<vmem>>) attributes {dimension_semantics = [#tpu.dimension_semantics<parallel>, #tpu.dimension_semantics<arbitrary>, #tpu.dimension_semantics<arbitrary>], iteration_bounds = array<i64: 1, 10, 1>, scalar_prefetch = 2 : i64, scratch_operands = 1 : i64, tpu.core_type = #tpu.core_type<tc>, window_params = [{transform_indices = @transform_0, window_bounds = array<i64: 16, 256>}, {transform_indices = @transform_1, window_bounds = array<i64: 1, 256, 128>}, {transform_indices = @transform_2, window_bounds = array<i64: 1, 256, 128>}, {transform_indices = @transform_3, window_bounds = array<i64: 1, 128, 256>}, {transform_indices = @transform_4, window_bounds = array<i64: 1, 16, 1>}, {transform_indices = @transform_5, window_bounds = array<i64: 16, 256>}]} {
    %c0_i32 = arith.constant 0 : i32
    %0 = arith.cmpi eq, %arg1, %c0_i32 : i32
    %c0_i32_0 = arith.constant 0 : i32
    %1 = arith.cmpi eq, %arg2, %c0_i32_0 : i32
    %2 = arith.andi %0, %1 : i1
    %3 = arith.extui %2 : i1 to i32
    %c0_i32_1 = arith.constant 0 : i32
    %4 = arith.cmpi ne, %3, %c0_i32_1 : i32
    scf.if %4 {
      %cst = arith.constant 0.000000e+00 : f32
      %15 = vector.broadcast %cst : f32 to vector<16x256xf32>
      %c0 = arith.constant 0 : index
      %c0_6 = arith.constant 0 : index
      %16 = vector.load %arg11[%c0, %c0_6] : memref<16x256xf32, #tpu.memory_space<vmem>>, vector<16x256xf32>
      tpu.vector_store %arg11[%c0, %c0_6], %15 {strides = array<i32>} : memref<16x256xf32, #tpu.memory_space<vmem>>, vector<16x256xf32>,
    } else {
    }
    %5 = arith.index_cast %arg1 : i32 to index
    %6 = memref.load %arg4[%5] : memref<10xi32, #tpu.memory_space<smem>>
    %c0_i32_2 = arith.constant 0 : i32
    %7 = arith.cmpi sgt, %6, %c0_i32_2 : i32
    %8 = arith.extui %7 : i1 to i32
    %c0_i32_3 = arith.constant 0 : i32
    %9 = arith.cmpi ne, %8, %c0_i32_3 : i32
    scf.if %9 {
      %c0 = arith.constant 0 : index
      %c0_6 = arith.constant 0 : index
      %15 = vector.load %arg5[%c0, %c0_6] : memref<16x256xbf16, #tpu.memory_space<vmem>>, vector<16x256xbf16>
      %c0_7 = arith.constant 0 : index
      %c0_8 = arith.constant 0 : index
      %c0_9 = arith.constant 0 : index
      %16 = vector.load %arg6[%c0_7, %c0_8, %c0_9] : memref<1x256x128xbf16, #tpu.memory_space<vmem>>, vector<1x256x128xbf16>
      %17 = vector.shape_cast %16 : vector<1x256x128xbf16> to vector<256x128xbf16>
      %cst = arith.constant dense<0.000000e+00> : vector<16x128xf32>
      %18 = tpu.matmul %15, %17, %cst {dimension_numbers = #tpu.dot_dimension_numbers<[1], [0], [0], [1], [0, 0, 1, 1], [], []>} : vector<16x256xbf16>, vector<256x128xbf16>, vector<16x128xf32> -> vector<16x128xf32>
      %c0_10 = arith.constant 0 : index
      %c0_11 = arith.constant 0 : index
      %c0_12 = arith.constant 0 : index
      %19 = vector.load %arg7[%c0_10, %c0_11, %c0_12] : memref<1x256x128xbf16, #tpu.memory_space<vmem>>, vector<1x256x128xbf16>
      %20 = vector.shape_cast %19 : vector<1x256x128xbf16> to vector<256x128xbf16>
      %cst_13 = arith.constant dense<0.000000e+00> : vector<16x128xf32>
      %21 = tpu.matmul %15, %20, %cst_13 {dimension_numbers = #tpu.dot_dimension_numbers<[1], [0], [0], [1], [0, 0, 1, 1], [], []>} : vector<16x256xbf16>, vector<256x128xbf16>, vector<16x128xf32> -> vector<16x128xf32>
      %22 = arith.negf %18 : vector<16x128xf32>
      %23 = math.exp %22 : vector<16x128xf32>
      %cst_14 = arith.constant 1.000000e+00 : f32
      %24 = vector.broadcast %cst_14 : f32 to vector<16x128xf32>
      %25 = arith.addf %24, %23 : vector<16x128xf32>
      %26 = arith.divf %24, %25 : vector<16x128xf32>
      %27 = arith.mulf %18, %26 : vector<16x128xf32>
      %28 = arith.mulf %27, %21 : vector<16x128xf32>
      %c0_15 = arith.constant 0 : index
      %c0_16 = arith.constant 0 : index
      %c0_17 = arith.constant 0 : index
      %29 = vector.load %arg9[%c0_15, %c0_16, %c0_17] : memref<1x16x1xf32, #tpu.memory_space<vmem>>, vector<1x16x1xf32>
      %30 = vector.shape_cast %29 : vector<1x16x1xf32> to vector<16x1xf32>
      %31 = vector.broadcast %30 : vector<16x1xf32> to vector<16x128xf32>
      %32 = arith.mulf %28, %31 : vector<16x128xf32>
      %c0_18 = arith.constant 0 : index
      %c0_19 = arith.constant 0 : index
      %33 = vector.load %arg11[%c0_18, %c0_19] : memref<16x256xf32, #tpu.memory_space<vmem>>, vector<16x256xf32>
      %34 = arith.truncf %32 : vector<16x128xf32> to vector<16x128xbf16>
      %c0_20 = arith.constant 0 : index
      %c0_21 = arith.constant 0 : index
      %c0_22 = arith.constant 0 : index
      %35 = vector.load %arg8[%c0_20, %c0_21, %c0_22] : memref<1x128x256xbf16, #tpu.memory_space<vmem>>, vector<1x128x256xbf16>
      %36 = vector.shape_cast %35 : vector<1x128x256xbf16> to vector<128x256xbf16>
      %cst_23 = arith.constant dense<0.000000e+00> : vector<16x256xf32>
      %37 = tpu.matmul %34, %36, %cst_23 {dimension_numbers = #tpu.dot_dimension_numbers<[1], [0], [0], [1], [0, 0, 1, 1], [], []>} : vector<16x128xbf16>, vector<128x256xbf16>, vector<16x256xf32> -> vector<16x256xf32>
      %38 = arith.addf %33, %37 : vector<16x256xf32>
      %c0_24 = arith.constant 0 : index
      %c0_25 = arith.constant 0 : index
      %39 = vector.load %arg11[%c0_24, %c0_25] : memref<16x256xf32, #tpu.memory_space<vmem>>, vector<16x256xf32>
      tpu.vector_store %arg11[%c0_24, %c0_25], %38 {strides = array<i32>} : memref<16x256xf32, #tpu.memory_space<vmem>>, vector<16x256xf32>,
    } else {
    }
    %c9_i32 = arith.constant 9 : i32
    %10 = arith.cmpi eq, %arg1, %c9_i32 : i32
    %c0_i32_4 = arith.constant 0 : i32
    %11 = arith.cmpi eq, %arg2, %c0_i32_4 : i32
    %12 = arith.andi %10, %11 : i1
    %13 = arith.extui %12 : i1 to i32
    %c0_i32_5 = arith.constant 0 : i32
    %14 = arith.cmpi ne, %13, %c0_i32_5 : i32
    scf.if %14 {
      %c0 = arith.constant 0 : index
      %c0_6 = arith.constant 0 : index
      %15 = vector.load %arg11[%c0, %c0_6] : memref<16x256xf32, #tpu.memory_space<vmem>>, vector<16x256xf32>
      %16 = arith.truncf %15 : vector<16x256xf32> to vector<16x256xbf16>
      %c0_7 = arith.constant 0 : index
      %c0_8 = arith.constant 0 : index
      %17 = vector.load %arg10[%c0_7, %c0_8] : memref<16x256xbf16, #tpu.memory_space<vmem>>, vector<16x256xbf16>
      tpu.vector_store %arg10[%c0_7, %c0_8], %16 {strides = array<i32>} : memref<16x256xbf16, #tpu.memory_space<vmem>>, vector<16x256xbf16>,
    } else {
    }
    return
  }
  func.func @transform_0(%arg0: i32, %arg1: i32, %arg2: i32, %arg3: memref<10xi32, #tpu.memory_space<smem>>, %arg4: memref<10xi32, #tpu.memory_space<smem>>) -> (i32, i32) {
    %c0_i32 = arith.constant 0 : i32
    %c0_i32_0 = arith.constant 0 : i32
    return %arg0, %c0_i32 : i32, i32
  }
  func.func @transform_1(%arg0: i32, %arg1: i32, %arg2: i32, %arg3: memref<10xi32, #tpu.memory_space<smem>>, %arg4: memref<10xi32, #tpu.memory_space<smem>>) -> (i32, i32, i32) {
    %0 = arith.index_cast %arg1 : i32 to index
    %1 = memref.load %arg4[%0] : memref<10xi32, #tpu.memory_space<smem>>
    %2 = arith.muli %arg2, %1 : i32
    %3 = arith.index_cast %arg1 : i32 to index
    %4 = memref.load %arg4[%3] : memref<10xi32, #tpu.memory_space<smem>>
    %c1_i32 = arith.constant 1 : i32
    %5 = arith.subi %c1_i32, %4 : i32
    %c0_i32 = arith.constant 0 : i32
    %6 = arith.muli %c0_i32, %5 : i32
    %7 = arith.addi %2, %6 : i32
    %8 = arith.index_cast %arg1 : i32 to index
    %9 = memref.load %arg3[%8] : memref<10xi32, #tpu.memory_space<smem>>
    %c0_i32_0 = arith.constant 0 : i32
    %c0_i32_1 = arith.constant 0 : i32
    return %9, %c0_i32_0, %7 : i32, i32, i32
  }
  func.func @transform_2(%arg0: i32, %arg1: i32, %arg2: i32, %arg3: memref<10xi32, #tpu.memory_space<smem>>, %arg4: memref<10xi32, #tpu.memory_space<smem>>) -> (i32, i32, i32) {
    %0 = arith.index_cast %arg1 : i32 to index
    %1 = memref.load %arg4[%0] : memref<10xi32, #tpu.memory_space<smem>>
    %2 = arith.muli %arg2, %1 : i32
    %3 = arith.index_cast %arg1 : i32 to index
    %4 = memref.load %arg4[%3] : memref<10xi32, #tpu.memory_space<smem>>
    %c1_i32 = arith.constant 1 : i32
    %5 = arith.subi %c1_i32, %4 : i32
    %c0_i32 = arith.constant 0 : i32
    %6 = arith.muli %c0_i32, %5 : i32
    %7 = arith.addi %2, %6 : i32
    %8 = arith.index_cast %arg1 : i32 to index
    %9 = memref.load %arg3[%8] : memref<10xi32, #tpu.memory_space<smem>>
    %c0_i32_0 = arith.constant 0 : i32
    %c0_i32_1 = arith.constant 0 : i32
    return %9, %c0_i32_0, %7 : i32, i32, i32
  }
  func.func @transform_3(%arg0: i32, %arg1: i32, %arg2: i32, %arg3: memref<10xi32, #tpu.memory_space<smem>>, %arg4: memref<10xi32, #tpu.memory_space<smem>>) -> (i32, i32, i32) {
    %0 = arith.index_cast %arg1 : i32 to index
    %1 = memref.load %arg4[%0] : memref<10xi32, #tpu.memory_space<smem>>
    %2 = arith.muli %arg2, %1 : i32
    %3 = arith.index_cast %arg1 : i32 to index
    %4 = memref.load %arg4[%3] : memref<10xi32, #tpu.memory_space<smem>>
    %c1_i32 = arith.constant 1 : i32
    %5 = arith.subi %c1_i32, %4 : i32
    %c0_i32 = arith.constant 0 : i32
    %6 = arith.muli %c0_i32, %5 : i32
    %7 = arith.addi %2, %6 : i32
    %8 = arith.index_cast %arg1 : i32 to index
    %9 = memref.load %arg3[%8] : memref<10xi32, #tpu.memory_space<smem>>
    %c0_i32_0 = arith.constant 0 : i32
    %c0_i32_1 = arith.constant 0 : i32
    return %9, %7, %c0_i32_0 : i32, i32, i32
  }
  func.func @transform_4(%arg0: i32, %arg1: i32, %arg2: i32, %arg3: memref<10xi32, #tpu.memory_space<smem>>, %arg4: memref<10xi32, #tpu.memory_space<smem>>) -> (i32, i32, i32) {
    %0 = arith.index_cast %arg1 : i32 to index
    %1 = memref.load %arg3[%0] : memref<10xi32, #tpu.memory_space<smem>>
    %c0_i32 = arith.constant 0 : i32
    %c0_i32_0 = arith.constant 0 : i32
    return %1, %arg0, %c0_i32 : i32, i32, i32
  }
  func.func @transform_5(%arg0: i32, %arg1: i32, %arg2: i32, %arg3: memref<10xi32, #tpu.memory_space<smem>>, %arg4: memref<10xi32, #tpu.memory_space<smem>>) -> (i32, i32) {
    %c0_i32 = arith.constant 0 : i32
    %c0_i32_0 = arith.constant 0 : i32
    return %arg0, %c0_i32 : i32, i32
  }
}

</mosaic_0001>

<bundles_post_ra>
// kernel: deepseek_v2_moe_forward.1
= control target key start
LH: loop header
LB: loop body
LE: loop exit
PB: predicated region body
PF: predicated region fallthrough
CT: control target
= control target key end

     0   :  { %s1684_s0 = inlined_call_operand.vmem [shape: s32[10], index: 0, kind: input, shape index: {}]   ;;  %s1685_s2 = inlined_call_operand.vmem [shape: bf16[16,256], index: 2, kind: input, shape index: {}]   ;;  %s1686_s3 = inlined_call_operand.vmem [shape: bf16[10,256,128], index: 3, kind: input, shape index: {}]   ;;  %s1687_s4 = inlined_call_operand.vmem [shape: bf16[10,256,128], index: 4, kind: input, shape index: {}]   ;;  %s1688_s5 = inlined_call_operand.vmem [shape: bf16[10,128,256], index: 5, kind: input, shape index: {}]   ;;  %s1689_s6 = inlined_call_operand.vmem [shape: f32[10,16,1], index: 6, kind: input, shape index: {}]   ;;  %s1690_s7 = inlined_call_operand.hbm [shape: bf16[16,256], index: 7, kind: output, shape index: {}]   ;;  %s1691_s1 = inlined_call_operand.vmem [shape: s32[10], index: 1, kind: input, shape index: {}]  }
   0x1   :  { %s12_s26 = sshll.u32 %s1684_s0, 4  ;;  %s16_s29 = sshll.u32 %s1691_s1, 4  ;;  %s13_s26 = int_to_ptr.vmem [resolvable:$true] %s12_s26  ;;  %s17_s29 = int_to_ptr.vmem [resolvable:$true] %s16_s29 }
   0x2   :  { %s1406_s30 = scalar_lea.vmem %s13_s26, 16  ;;  %p1411_p1 = scmp.lt.s32.totalorder %s13_s26, %s13_s26 }
   0x3   :  { %p1407_p0 = scmp.ne.s32.totalorder %s13_s26, %s1406_s30  ;;  %p1412_p2 = scmp.lt.s32.totalorder %s1406_s30, %s1406_s30 }
   0x5   :  { %p1413_p3 = por %p1412_p2, %p1411_p1 }
   0x7   :  { %p1414_p4 = pnand %p1413_p3, %p1407_p0 }
   0x9   :  { %1417 = shalt.err (!%p1414_p4)  }
   0xa   :  { %s1486_s8 = smov [#allocation4]   ;;  %s1418_s9 = scalar_lea.vmem %s17_s29, 16 }
   0xb   :  { %15 = dma.vmem_to_smem %s13_s26, 16, %s1486_s8, [#allocation3] }
   0xc   :  { %p1419_p5 = scmp.ne.s32.totalorder %s17_s29, %s1418_s9  ;;  %p1423_p6 = scmp.lt.s32.totalorder %s17_s29, %s17_s29 }
   0xd   :  { %p1424_p7 = scmp.lt.s32.totalorder %s1418_s9, %s1418_s9 }
   0xf   :  { %p1425_p8 = por %p1424_p7, %p1423_p6 }
  0x11   :  { %p1426_p9 = pnand %p1425_p8, %p1419_p5 }
  0x13   :  { %1429 = shalt.err (!%p1426_p9)  }
  0x14   :  { %s1487_s0 = smov [#allocation5]  }
  0x15   :  { %19 = dma.vmem_to_smem %s17_s29, 16, %s1487_s0, [#allocation3] }
  0x16   :  { %1468 = dma.done.wait [#allocation3], 32 }
  0x17   :  { %1469 = vsyncadd [#allocation3], 4294967264 }
  0x18   :  { %21 = sfence }
  0x19   :  { %22 = vsyncpa [#allocation7], 0  ;;  %s1539_s1 = smov 0   ;;  %s1541_s10 = smov 0  }
  0x1a   :  { %s1543_s11 = smov 0  }
  0x1b LB: > { %s1175_s12 = sadd.s32 4294967295, %s1484_s11   ;;  %s43_s13 = sadd.s32 1, %s1480_s10  ;;  %s1484_s11 = sphi %s1543_s11, %s28_s11   ;;  %s1480_s10 = sphi %s1541_s10, %s1694_s10   ;;  %s1476_s1 = sphi %s1539_s1, %s1693_s1  }
  0x1c   : > { %p45_p10 = scmp.ge.s32.totalorder %s43_s13, 10  ;;  %p1179_p11 = scmp.ge.s32.totalorder %s1484_s11, 1 }
  0x1d   : > { %p326_p12 = scmp.lt.s32.totalorder %s1484_s11, 11 }
  0x1e   : > { %s1696_s13 = smov (%p45_p10, %s43_s13), 0 }
  0x1f   : > { %p327_p13 = pnand %p1179_p11, %p326_p12 }
  0x20   : > { %s404_s14 = sld [smem:[#allocation4 + %s1476_s1]] (!%p327_p13)  ;;  %p461_p0 = scmp.eq.s32.totalorder (!%p327_p13), %s1476_s1, 0 }
  0x21   : > { %330 = sbr.rel (%p327_p13) target bundleno = 599 (0x257), region = 40  ;;  %s418_s15 = sld [smem:[#allocation4 + %s1476_s1]] (!%p327_p13) }
  0x22   : > { %s432_s16 = sld [smem:[#allocation4 + %s1476_s1]] (!%p327_p13) }
  0x23   : > { %s447_s17 = sld [smem:[#allocation4 + %s1476_s1]] (!%p327_p13) }
  0x26   : > { %p405_p1 = scmp.lt.s32.totalorder (!%p327_p13), %s404_s14, 9 }
  0x27   : > { %p419_p2 = scmp.lt.s32.totalorder (!%p327_p13), %s418_s15, 9 }
  0x28   : > { %p434_p3 = scmp.lt.s32.totalorder %s432_s16, 9  ;;  %s1698_s14 = smov (!%p405_p1, %s404_s14), 9  ;;  %v1488_v0 = vmov (%p461_p0), 0.0  }
  0x29   : > { %s1700_s15 = smov (!%p419_p2, %s418_s15), 9  ;;  %s1249_s18 = sshll.u32 %s1698_s14, 7  ;;  %467 = vst [vmem:[#allocation2] sm:$0xff] (%p461_p0), %v1488_v0  ;;  %468 = vst [vmem:[#allocation2 + $0x8] sm:$0xff] (%p461_p0), %v1488_v0 }
  0x2a   : > { %p449_p4 = scmp.lt.s32.totalorder %s447_s17, 9  ;;  %s1568_s21 = scalar_lea.vmem %s1686_s3, %s1249_s18  ;;  %469 = vst [vmem:[#allocation2 + $0x10] sm:$0xff] (%p461_p0), %v1488_v0  ;;  %470 = vst [vmem:[#allocation2 + $0x18] sm:$0xff] (%p461_p0), %v1488_v0 }
  0x2b   : > { %s1250_s22 = sshll.u32 %s1700_s15, 7  ;;  %s1702_s16 = smov (!%p434_p3, %s432_s16), 9 }
  0x2c   : > { %s1573_s25 = scalar_lea.vmem %s1687_s4, %s1250_s22  ;;  %s1704_s17 = smov (!%p449_p4, %s447_s17), 9 }
  0x2d   : > { %s1251_s26 = sshll.u32 %s1702_s16, 7  ;;  %s1252_s30 = sshll.u32 %s1704_s17, 4 }
  0x2e   : > { %s1578_s29 = scalar_lea.vmem %s1688_s5, %s1251_s26  ;;  %s1583_s0 = scalar_lea.vmem %s1689_s6, %s1252_s30 }
  0x2f   : > { %466 = sbr.rel (!%p461_p0) target bundleno = 54 (0x36), region = 44 }
  0x36 PF: > { %s471_s14 = sld [smem:[#allocation5 + %s1476_s1]] }
  0x3c   : > { %p1189_p5 = scmp.le.s32.totalorder %s471_s14, 0 }
  0x3d   : > { %v1339_v1 = vld [vmem:[%s1568_s21 + $0x40] sm:$0xff] (!%p1189_p5)   ;;  %v1489_v3 = vmov (!%p1189_p5), 0   ;;  %v1341_v4 = vld [vmem:[%s1568_s21 + $0x48] sm:$0xff] (!%p1189_p5)   ;;  %v1343_v6 = vld [vmem:[%s1568_s21 + $0x50] sm:$0xff] (!%p1189_p5)  }
  0x3e   : > { %475 = sbr.rel (%p1189_p5) target bundleno = 563 (0x233), region = 48  ;;  %v1340_v2 = vld [vmem:[%s1568_s21] sm:$0xff] (!%p1189_p5)   ;;  %1338 = vset.pattern.permute.xlu0 (!%p1189_p5), %v1489_v3  ;;  %1257 = vmatprep.subr.bf16.mxu0 (!%p1189_p5), %v1339_v1  ;;  %v1342_v5 = vld [vmem:[%s1568_s21 + $0x8] sm:$0xff] (!%p1189_p5)   ;;  %v1344_v7 = vld [vmem:[%s1568_s21 + $0x10] sm:$0xff] (!%p1189_p5)  }
  0x3f   : > { %1258 = vmatpush3.bf16.msra.mxu0 (!%p1189_p5), %v1340_v2  ;;  %v1345_v8 = vld [vmem:[%s1568_s21 + $0x58] sm:$0xff] (!%p1189_p5)   ;;  %v1347_v10 = vld [vmem:[%s1568_s21 + $0x60] sm:$0xff] (!%p1189_p5)   ;;  %v1349_v14 = vld [vmem:[%s1568_s21 + $0x68] sm:$0xff] (!%p1189_p5)  }
  0x40   : > { %1259 = vmatprep.subr.bf16.mxu0 (!%p1189_p5), %v1341_v4  ;;  %v1346_v9 = vld [vmem:[%s1568_s21 + $0x18] sm:$0xff] (!%p1189_p5)   ;;  %v1348_v11 = vld [vmem:[%s1568_s21 + $0x20] sm:$0xff] (!%p1189_p5)   ;;  %v1350_v15 = vld [vmem:[%s1568_s21 + $0x28] sm:$0xff] (!%p1189_p5)  }
  0x41   : > { %v1353_v12 = vld [vmem:[%s1573_s25 + $0x40] sm:$0xff] (!%p1189_p5)   ;;  %v1357_v16 = vld [vmem:[%s1573_s25 + $0x48] sm:$0xff] (!%p1189_p5)   ;;  %v1351_v18 = vld [vmem:[%s1568_s21 + $0x70] sm:$0xff] (!%p1189_p5)  }
  0x42   : > { %v1354_v13 = vld [vmem:[%s1573_s25] sm:$0xff] (!%p1189_p5)   ;;  %1279 = vmatprep.subr.bf16.mxu1 (!%p1189_p5), %v1353_v12  ;;  %v1358_v17 = vld [vmem:[%s1573_s25 + $0x8] sm:$0xff] (!%p1189_p5)   ;;  %v1352_v19 = vld [vmem:[%s1568_s21 + $0x30] sm:$0xff] (!%p1189_p5)  }
  0x43   : > { %1260 = vmatpush3.bf16.msra.mxu0 (!%p1189_p5), %v1342_v5  ;;  %1280 = vmatpush3.bf16.msra.mxu1 (!%p1189_p5), %v1354_v13  ;;  %v1361_v20 = vld [vmem:[%s1685_s2 + $0x4] ss:$8 sps:$4 sm:$0xff] (!%p1189_p5)   ;;  %v1355_v21 = vld [vmem:[%s1568_s21 + $0x78] sm:$0xff] (!%p1189_p5)   ;;  %v1362_v22 = vld [vmem:[%s1573_s25 + $0x50] sm:$0xff] (!%p1189_p5)  }
  0x44   : > { %1261 = vmatprep.subr.bf16.mxu0 (!%p1189_p5), %v1343_v6  ;;  %1281 = vmatprep.subr.bf16.mxu1 (!%p1189_p5), %v1357_v16  ;;  %v1363_v23 = vld [vmem:[%s1573_s25 + $0x10] sm:$0xff] (!%p1189_p5)   ;;  %v1364_v24 = vld [vmem:[%s1573_s25 + $0x58] sm:$0xff] (!%p1189_p5)   ;;  %v1366_v26 = vld [vmem:[%s1573_s25 + $0x60] sm:$0xff] (!%p1189_p5)  }
  0x45   : > { %648 = vmatprep.mubr.bf16.mxu0 %v1361_v20  ;;  %v1365_v25 = vld [vmem:[%s1573_s25 + $0x18] sm:$0xff]   ;;  %817 = vmatprep.mubr.bf16.mxu1 %v1361_v20  ;;  %v1359_v28 = vld [vmem:[%s1685_s2] ss:$8 sps:$4 sm:$0xff]   ;;  %v1370_v32 = vld [vmem:[%s1573_s25 + $0x70] sm:$0xff]  }
  0x46   : > { %v1356_v27 = vld [vmem:[%s1568_s21 + $0x38] sm:$0xff]   ;;  %v1367_v29 = vld [vmem:[%s1573_s25 + $0x20] sm:$0xff]   ;;  %v1368_v30 = vld [vmem:[%s1573_s25 + $0x68] sm:$0xff]  }
  0x47   : > { %1262 = vmatpush3.bf16.msra.mxu0 %v1344_v7  ;;  %1282 = vmatpush3.bf16.msra.mxu1 %v1358_v17  ;;  %v1369_v31 = vld [vmem:[%s1573_s25 + $0x28] sm:$0xff]   ;;  %v842_v33 = vld [vmem:[%s1583_s0] sm:$0xff]  ;;  %v1371_v35 = vld [vmem:[%s1573_s25 + $0x30] sm:$0xff]  }
  0x48   : > { %1263 = vmatprep.subr.bf16.mxu0 %v1345_v8  ;;  %1283 = vmatprep.subr.bf16.mxu1 %v1362_v22  ;;  %v843_v34 = vld [vmem:[%s1583_s0 + $0x8] sm:$0xff]  ;;  %v1372_v36 = vld [vmem:[%s1573_s25 + $0x78] sm:$0xff]   ;;  %v858_v22 = vld [vmem:[#allocation2 + $0x10] sm:$0xff] }
  0x49   : > { %846 = vperm.xlu0 %1338, %v842_v33   ;;  %v1373_v37 = vld [vmem:[%s1573_s25 + $0x38] sm:$0xff]   ;;  %v1376_v38 = vld [vmem:[%s1578_s29 + $0x4] ss:$8 sps:$4 sm:$0xff]   ;;  %v1374_v39 = vld [vmem:[%s1578_s29] ss:$8 sps:$4 sm:$0xff]  }
  0x4a   : > { %v1379_v40 = vld [vmem:[%s1578_s29 + $0x14] ss:$8 sps:$4 sm:$0xff]   ;;  %v1377_v41 = vld [vmem:[%s1578_s29 + $0x10] ss:$8 sps:$4 sm:$0xff]   ;;  %v1382_v42 = vld [vmem:[%s1578_s29 + $0x24] ss:$8 sps:$4 sm:$0xff]  }
  0x4b   : > { %1264 = vmatpush3.bf16.msra.mxu0 %v1346_v9  ;;  %1284 = vmatpush3.bf16.msra.mxu1 %v1363_v23  ;;  %v1380_v43 = vld [vmem:[%s1578_s29 + $0x20] ss:$8 sps:$4 sm:$0xff]   ;;  %v1385_v44 = vld [vmem:[%s1578_s29 + $0x34] ss:$8 sps:$4 sm:$0xff]   ;;  %v1383_v45 = vld [vmem:[%s1578_s29 + $0x30] ss:$8 sps:$4 sm:$0xff]  }
  0x4c   : > { %1265 = vmatprep.subr.bf16.mxu0 %v1347_v10  ;;  %1285 = vmatprep.subr.bf16.mxu1 %v1364_v24  ;;  %v1388_v46 = vld [vmem:[%s1578_s29 + $0x44] ss:$8 sps:$4 sm:$0xff]   ;;  %v1386_v47 = vld [vmem:[%s1578_s29 + $0x40] ss:$8 sps:$4 sm:$0xff]   ;;  %v1391_v48 = vld [vmem:[%s1578_s29 + $0x54] ss:$8 sps:$4 sm:$0xff]  }
  0x4d   : > { %851 = vperm.xlu0 %1338, %v843_v34   ;;  %v1389_v49 = vld [vmem:[%s1578_s29 + $0x50] ss:$8 sps:$4 sm:$0xff]   ;;  %v1394_v50 = vld [vmem:[%s1578_s29 + $0x64] ss:$8 sps:$4 sm:$0xff]   ;;  %v1392_v51 = vld [vmem:[%s1578_s29 + $0x60] ss:$8 sps:$4 sm:$0xff]  }
  0x4e   : > { %v1397_v52 = vld [vmem:[%s1578_s29 + $0x74] ss:$8 sps:$4 sm:$0xff]   ;;  %v1395_v53 = vld [vmem:[%s1578_s29 + $0x70] ss:$8 sps:$4 sm:$0xff]   ;;  %v857_v20 = vld [vmem:[#allocation2 + $0x8] sm:$0xff] }
  0x4f   : > { %1266 = vmatpush3.bf16.msra.mxu0 %v1348_v11  ;;  %1286 = vmatpush3.bf16.msra.mxu1 %v1365_v25  ;;  %v859_v25 = vld [vmem:[#allocation2 + $0x18] sm:$0xff] }
  0x50   : > { %1267 = vmatprep.subr.bf16.mxu0 %v1349_v14  ;;  %1287 = vmatprep.subr.bf16.mxu1 %v1366_v26 }
  0x53   : > { %1268 = vmatpush3.bf16.msra.mxu0 %v1350_v15  ;;  %1288 = vmatpush3.bf16.msra.mxu1 %v1367_v29 }
  0x54   : > { %1269 = vmatprep.subr.bf16.mxu0 %v1351_v18  ;;  %1289 = vmatprep.subr.bf16.mxu1 %v1368_v30 }
  0x57   : > { %1270 = vmatpush3.bf16.msra.mxu0 %v1352_v19  ;;  %1290 = vmatpush3.bf16.msra.mxu1 %v1369_v31  ;;  %v856_v19 = vld [vmem:[#allocation2] sm:$0xff] }
  0x58   : > { %1271 = vmatprep.subr.bf16.mxu0 %v1355_v21  ;;  %1291 = vmatprep.subr.bf16.mxu1 %v1370_v32 }
  0x5b   : > { %1272 = vmatpush3.bf16.msra.mxu0 %v1356_v27  ;;  %1292 = vmatpush3.bf16.msra.mxu1 %v1371_v35 }
  0x5c   : > { %1293 = vmatprep.subr.bf16.mxu1 %v1372_v36  ;;  %957 = vmatprep.subr.bf16.mxu0 %v1376_v38 }
  0x5e   : > { %649 = vmatmul.mubr.bf16.vlgmr.msra.gmra.mrb[0].mxu0 %v1359_v28 }
  0x5f   : > { %989 = vmatprep.mubr.bf16.mxu0 %v1489_v3  ;;  %1294 = vmatpush3.bf16.msra.mxu1 %v1373_v37 }
  0x60   : > { %958 = vmatpush1.bf16.msra.mxu0 %v1374_v39 }
  0x61   : > { %959 = vmatprep.subr.bf16.mxu0 %v1379_v40 }
  0x62   : > { %818 = vmatmul.mubr.bf16.vlgmr.msra.gmra.mrb[0].mxu1 %v1359_v28 }
  0x64   : > { %960 = vmatpush1.bf16.msra.mxu0 %v1377_v41 }
  0x65   : > { %961 = vmatprep.subr.bf16.mxu0 %v1382_v42 }
  0x68   : > { %962 = vmatpush1.bf16.msra.mxu0 %v1380_v43 }
  0x69   : > { %963 = vmatprep.subr.bf16.mxu0 %v1385_v44 }
  0x6c   : > { %964 = vmatpush1.bf16.msra.mxu0 %v1383_v45 }
  0x6d   : > { %965 = vmatprep.subr.bf16.mxu0 %v1388_v46 }
  0x70   : > { %966 = vmatpush1.bf16.msra.mxu0 %v1386_v47 }
  0x71   : > { %967 = vmatprep.subr.bf16.mxu0 %v1391_v48 }
  0x74   : > { %968 = vmatpush1.bf16.msra.mxu0 %v1389_v49 }
  0x75   : > { %969 = vmatprep.subr.bf16.mxu0 %v1394_v50 }
  0x78   : > { %970 = vmatpush1.bf16.msra.mxu0 %v1392_v51 }
  0x79   : > { %971 = vmatprep.subr.bf16.mxu0 %v1397_v52 }
  0x7c   : > { %972 = vmatpush1.bf16.msra.mxu0 %v1395_v53 }
  0xc8   : > { %v847_v9 = vpop.permute.xlu0 %846 }
  0xcc   : > { %v852_v15 = vpop.permute.xlu0 %851 }
 0x131   : > { %v1273_v54 = vpop.f32.mrb[0].mxu0 }
 0x132   : > { %v1274_v55 = vpop.f32.mrb[1].mxu0 }
 0x133   : > { %v1275_v56 = vadd.f32 %v1274_v55, %v1273_v54  ;;  %v1276_v57 = vpop.f32.mrb[2].mxu0 }
 0x134   : > { %v1277_v58 = vpop.f32.mrb[3].mxu0 }
 0x135   : > { %v1224_v59 = vmul.f32 -1.442695, %v1275_v56  ;;  %v1278_v60 = vadd.f32 %v1277_v58, %v1276_v57  ;;  %v1295_v62 = vpop.f32.mrb[0].mxu1 }
 0x136   : > { %v1296_v63 = vpop.f32.mrb[1].mxu1 }
 0x137   : > { %1398 = vpow2.f32 %v1224_v59  ;;  %v1225_v61 = vmul.f32 -1.442695, %v1278_v60  ;;  %v1297_v1 = vadd.f32 %v1296_v63, %v1295_v62  ;;  %v1298_v2 = vpop.f32.mrb[2].mxu1 }
 0x138   : > { %v1299_v4 = vpop.f32.mrb[3].mxu1 }
 0x139   : > { %1400 = vpow2.f32 %v1225_v61  ;;  %v1300_v6 = vadd.f32 %v1299_v4, %v1298_v2 }
 0x141   : > { %v1399_v0 = vpop.eup %1398 }
 0x142   : > { %v832_v3 = vadd.f32 1.0, %v1399_v0 }
 0x143   : > { %v1401_v5 = vpop.eup %1400 }
 0x144   : > { %1402 = vrcp.f32 %v832_v3  ;;  %v833_v7 = vadd.f32 1.0, %v1401_v5 }
 0x146   : > { %1404 = vrcp.f32 %v833_v7 }
 0x14e   : > { %v1403_v8 = vpop.eup %1402 }
 0x14f   : > { %v838_v10 = vmul.f32 %v1403_v8, %v1275_v56 }
 0x150   : > { %v1405_v11 = vpop.eup %1404 }
 0x151   : > { %v839_v12 = vmul.f32 %v1405_v11, %v1278_v60  ;;  %v840_v13 = vmul.f32 %v1297_v1, %v838_v10 }
 0x153   : > { %v841_v14 = vmul.f32 %v1300_v6, %v839_v12  ;;  %v854_v16 = vmul.f32 %v847_v9, %v840_v13 }
 0x155   : > { %v855_v17 = vmul.f32 %v852_v15, %v841_v14 }
 0x157   : > { %v860_v18 = vpack.c.bf16 %v855_v17, %v854_v16 }
 0x159   : > { %990 = vmatmul.mubr.bf16.vlgmr.msra.gmra.mrb[4].mxu0 %v860_v18 }
 0x22c   : > { %v991_v21 = vpop.f32.mrb[4].mxu0 }
 0x22d   : > { %v1000_v23 = vadd.f32 %v991_v21, %v856_v19  ;;  %v993_v24 = vpop.f32.mrb[5].mxu0 }
 0x22e   : > { %v1001_v26 = vadd.f32 %v993_v24, %v857_v20  ;;  %v995_v27 = vpop.f32.mrb[6].mxu0 }
 0x22f   : > { %1004 = vst [vmem:[#allocation2] sm:$0xff] %v1000_v23  ;;  %v1002_v28 = vadd.f32 %v995_v27, %v858_v22  ;;  %v997_v29 = vpop.f32.mrb[7].mxu0 }
 0x230   : > { %1005 = vst [vmem:[#allocation2 + $0x8] sm:$0xff] %v1001_v26  ;;  %v1003_v30 = vadd.f32 %v997_v29, %v859_v25 }
 0x231   : > { %1006 = vst [vmem:[#allocation2 + $0x10] sm:$0xff] %v1002_v28 }
 0x232   : > { %1007 = vst [vmem:[#allocation2 + $0x18] sm:$0xff] %v1003_v30 }
 0x233 PF: > { %p1008_p6 = scmp.eq.s32.totalorder %s1476_s1, 9 }
 0x235   : > { %1012 = sbr.rel (!%p1008_p6) target bundleno = 573 (0x23d), region = 52 }
 0x236   : > { %v1013_v31 = vld [vmem:[#allocation2] sm:$0xff] (%p1008_p6) }
 0x237   : > { %v1014_v32 = vld [vmem:[#allocation2 + $0x8] sm:$0xff] (%p1008_p6) }
 0x238   : > { %v1015_v33 = vld [vmem:[#allocation2 + $0x10] sm:$0xff] (%p1008_p6)  ;;  %v1255_v34 = vpack.c.bf16 (%p1008_p6), %v1014_v32, %v1013_v31 }
 0x239   : > { %v1016_v35 = vld [vmem:[#allocation2 + $0x18] sm:$0xff] (%p1008_p6) }
 0x23a   : > { %v1256_v36 = vpack.c.bf16 (%p1008_p6), %v1016_v35, %v1015_v33  ;;  %1029 = vst [vmem:[#allocation6] sm:$0xff] (%p1008_p6), %v1255_v34 }
 0x23c   : > { %1030 = vst [vmem:[#allocation6 + $0x8] sm:$0xff] %v1256_v36 }
 0x23d PF: > { %p1649_p7 = scmp.eq.s32.totalorder %s1175_s12, 9  ;;  %s1490_s20 = smov [#allocation6]  }
 0x23e   : > { %s1041_s21 = sshll.u32 %s1490_s20, 4  ;;  %s1042_s21 = int_to_ptr.vmem [resolvable:$true] %s1041_s21 }
 0x23f   : > { %s1430_s1 = scalar_lea.vmem %s1042_s21, 256  ;;  %p1437_p11 = scmp.lt.s32.totalorder %s1042_s21, %s1042_s21 }
 0x240   : > { %p1431_p8 = scmp.ne.s32.totalorder %s1042_s21, %s1430_s1  ;;  %p1438_p12 = scmp.lt.s32.totalorder %s1430_s1, %s1430_s1 }
 0x242   : > { %p1432_p9 = pnand %p1431_p8, %p1649_p7  ;;  %p1439_p13 = por %p1438_p12, %p1437_p11 }
 0x244   : > { %p1433_p10 = pneg %p1432_p9 }
 0x246   : > { %p1440_p0 = pnand %p1439_p13, %p1433_p10 }
 0x248   : > { %1443 = shalt.err (!%p1440_p0)
}
 0x249   : > { %s1444_s12 = scalar_lea.hbm %s1690_s7, 256 }
 0x24a   : > { %p1445_p1 = scmp.ne.s32.totalorder %s1690_s7, %s1444_s12  ;;  %p1450_p4 = scmp.lt.u32.totalorder %s1444_s12, %s1690_s7 }
 0x24c   : > { %p1446_p2 = pnand %p1445_p1, %p1649_p7 }
 0x24e   : > { %p1447_p3 = pneg %p1446_p2 }
 0x250   : > { %p1452_p5 = pnand %p1450_p4, %p1447_p3 }
 0x252   : > { %1455 = shalt.err (!%p1452_p5)
}
 0x253   : > { %s1491_s28 = smov 128   ;;  %s1492_s29 = smov 8  }
 0x254   : > { %1302 = dma.vmem_to_hbm [thread:$0]  (%p1649_p7), %s1042_s21, 256, %s1690_s7, [#allocation7], %s1491_s28, %s1491_s28, %s1492_s29  }
 0x255   : > { %1471 = dma.done.wait (%p1649_p7), [#allocation7], 256  }
 0x256   : > { %1473 = vsyncadd (%p1649_p7), [#allocation7], 4294967040 }
 0x257 PF: > { %s28_s11 = sadd.s32 1, %s1484_s11   ;;  %s1693_s1 = smov %s1480_s10 }
 0x258   : > { %p25_p6 = scmp.ge.s32.totalorder %s28_s11, 12   ;;  %s1694_s10 = smov %s1696_s13 }
 0x25a   :  { %27 = sbr.rel (!%p25_p6) target bundleno = 27 (0x1b), region = 92 }
 0x261   :  { %1057 = vsyncpa [#allocation7], 1 }
 0x262   :  { %1059 = vsyncpa [#allocation7 + $0x1], 1 }

</bundles_post_ra>
